<compile_context>
chip_gen: v6e
topology: v6e:2x2x1
jax: 0.10.0
libtpu: 0.0.40
codegen_flags: <defaults>
</compile_context>

<pallas_src>
import jax
import jax.numpy as jnp
from jax.experimental import pallas as pl
from jax.experimental.pallas import tpu as pltpu


def _joint_kernel(enc_ref, dec_ref, we_ref, wd_ref, b1_ref, w2_ref, b2_ref,
                  out_ref, h_ref):
    # enc_ref: (1, t_tile, H) bf16    dec_ref: (1, U, H) bf16
    # we_ref/wd_ref: (H, D) bf16      b1_ref: (1, D) f32
    # w2_ref: (D, v_tile) bf16        b2_ref: (1, v_tile) f32
    # out_ref: (1, t_tile*U, v_tile)  h_ref: (t_tile*U, D) bf16 scratch
    vi = pl.program_id(2)

    # The hidden h depends only on (b, ti): compute it on the first vocab tile
    # (vocab is the innermost "arbitrary" axis, so it runs sequentially per
    # (b, ti) on a single core) and reuse it from VMEM scratch afterwards.
    @pl.when(vi == 0)
    def _():
        enc = enc_ref[0]                                           # (t_tile, H)
        dec = dec_ref[0]                                           # (U, H)
        # concat([enc, dec]) @ W1^T + b1  ==  enc @ We + dec @ Wd + b1
        enc_p = jnp.dot(enc, we_ref[...],
                        preferred_element_type=jnp.float32) + b1_ref[...]   # (t_tile, D)
        dec_p = jnp.dot(dec, wd_ref[...],
                        preferred_element_type=jnp.float32)                 # (U, D)
        # Broadcast-add over the (t, u) grid and tanh in f32 (VPU/EUP), then
        # cast to bf16 only for the projection matmul operand.
        h = jnp.tanh(enc_p[:, None, :] + dec_p[None, :, :])        # (t_tile, U, D)
        h_ref[...] = h.reshape(h_ref.shape).astype(h_ref.dtype)

    # Projection: a single 2-D MXU matmul (M = t_tile*U, K = D, N = v_tile).
    out = jnp.dot(h_ref[...], w2_ref[...], preferred_element_type=jnp.float32)
    out_ref[0] = (out + b2_ref[...]).astype(out_ref.dtype)


def _pick_v_tile(V):
    """Vocab tile: a lane-dense multiple of 128 when possible, capped for VMEM."""
    if V % 128 != 0:
        # Small / ragged vocab (demo: V=32): single tile; stores are masked.
        # TODO(synk): pad V up to a multiple of 128 for fully lane-dense stores.
        return V
    for cand in (1024, 512, 256, 128):
        if V % cand == 0:
            return cand
    return 128


def _pick_t_tile(T, U, v_tile, out_bytes):
    """Time tile: divisor of T keeping the sublane axis a multiple of 8 (or the
    full T) and the double-buffered output block under ~8 MiB.  Halve the cap
    when re-deriving for v7x's 64 MiB VMEM."""
    cands = [d for d in range(1, T + 1) if T % d == 0 and (d % 8 == 0 or d == T)]
    best = cands[0]
    for d in cands:
        if 2 * d * U * v_tile * out_bytes <= 8 * 1024 * 1024:
            best = d
    return best


def joint_net_forward(enc, dec, w1, b1, w2, b2, *, t_tile=None, v_tile=None,
                      out_dtype=None):
    """enc: (B,T,H), dec: (B,U,H); w1: (D, 2H), b1: (D,), w2: (V, D), b2: (V,).

    Returns (B, T, U, V) logits.  Pass out_dtype=jnp.bfloat16 to halve the
    (dominant) output writeback bytes when the consumer tolerates bf16 logits.
    """
    B, T, H = enc.shape
    Bd, U, Hd = dec.shape
    assert B == Bd and H == Hd
    D = w1.shape[0]
    V = w2.shape[0]
    assert w1.shape == (D, 2 * H) and w2.shape == (V, D)
    assert b1.shape == (D,) and b2.shape == (V,)

    out_dtype = enc.dtype if out_dtype is None else out_dtype
    out_bytes = jnp.dtype(out_dtype).itemsize

    if v_tile is None:
        v_tile = _pick_v_tile(V)
    assert V % v_tile == 0
    if t_tile is None:
        t_tile = _pick_t_tile(T, U, v_tile, out_bytes)
    assert T % t_tile == 0

    # --- glue (plain JAX): bf16 MXU operands, weights pre-transposed (in, out) ---
    cdt = jnp.bfloat16
    enc_c = enc.astype(cdt)
    dec_c = dec.astype(cdt)
    we = w1[:, :H].T.astype(cdt)           # (H, D) — enc half of the concat
    wd = w1[:, H:].T.astype(cdt)           # (H, D) — dec half of the concat
    w2t = w2.T.astype(cdt)                 # (D, V)
    b1r = b1.reshape(1, D).astype(jnp.float32)
    b2r = b2.reshape(1, V).astype(jnp.float32)

    grid = (B, T // t_tile, V // v_tile)

    # Per-step VMEM estimate (double-buffered pipeline blocks + single scratch)
    # drives vmem_limit_bytes so large tiles aren't rejected by the default
    # scoped limit (16/32 MiB depending on generation).
    est = 2 * (t_tile * H * 2            # enc block (bf16)
               + U * H * 2               # dec block (bf16)
               + 2 * H * D * 2           # We + Wd (bf16)
               + D * 4                   # b1 (f32)
               + D * v_tile * 2          # W2^T tile (bf16)
               + v_tile * 4              # b2 tile (f32)
               + t_tile * U * v_tile * out_bytes)   # output block
    est += t_tile * U * D * 2            # h scratch (bf16, single-buffered)
    vmem_limit = int(min(max(32 * 1024 * 1024, est * 5 // 4), 112 * 1024 * 1024))

    out_flat = pl.pallas_call(
        _joint_kernel,
        out_shape=jax.ShapeDtypeStruct((B, T * U, V), out_dtype),
        grid_spec=pltpu.PrefetchScalarGridSpec(
            num_scalar_prefetch=0,
            grid=grid,
            in_specs=[
                pl.BlockSpec((1, t_tile, H), lambda b, ti, vi: (b, ti, 0)),   # enc tile
                pl.BlockSpec((1, U, H),      lambda b, ti, vi: (b, 0, 0)),    # dec (full U) for batch b
                pl.BlockSpec((H, D),         lambda b, ti, vi: (0, 0)),       # We
                pl.BlockSpec((H, D),         lambda b, ti, vi: (0, 0)),       # Wd
                pl.BlockSpec((1, D),         lambda b, ti, vi: (0, 0)),       # b1
                pl.BlockSpec((D, v_tile),    lambda b, ti, vi: (0, vi)),      # W2^T vocab tile
                pl.BlockSpec((1, v_tile),    lambda b, ti, vi: (0, vi)),      # b2 vocab tile
            ],
            out_specs=pl.BlockSpec((1, t_tile * U, v_tile),
                                   lambda b, ti, vi: (b, ti, vi)),
            scratch_shapes=[pltpu.VMEM((t_tile * U, D), jnp.bfloat16)],
        ),
        compiler_params=pltpu.CompilerParams(
            dimension_semantics=("parallel", "parallel", "arbitrary"),
            vmem_limit_bytes=vmem_limit,
        ),
    )(enc_c, dec_c, we, wd, b1r, w2t, b2r)

    # Free reshape: (B, T*U, V) and (B, T, U, V) share the same row-major layout.
    return out_flat.reshape(B, T, U, V)


def joint_net_reference(enc, dec, w1, b1, w2, b2):
    """Pure-JAX f32 reference matching the PyTorch forward exactly."""
    B, T, H = enc.shape
    _, U, _ = dec.shape
    enc_e = jnp.broadcast_to(enc[:, :, None, :], (B, T, U, H))
    dec_e = jnp.broadcast_to(dec[:, None, :, :], (B, T, U, H))
    concat = jnp.concatenate([enc_e, dec_e], axis=-1)            # (B,T,U,2H)
    h = jnp.tanh(concat @ w1.T + b1)                             # (B,T,U,D)
    return h @ w2.T + b2                                         # (B,T,U,V)


if __name__ == "__main__":
    # Small shapes consistent with the module.
    B, T, U = 2, 8, 8
    H = 32          # input_size (per-stream hidden)
    D = 64          # inner_dim
    V = 32          # vocab_size

    key = jax.random.PRNGKey(0)
    k_enc, k_dec, k_w1, k_b1, k_w2, k_b2 = jax.random.split(key, 6)

    enc = jax.random.normal(k_enc, (B, T, H), dtype=jnp.float32)
    dec = jax.random.normal(k_dec, (B, U, H), dtype=jnp.float32)

    # Parameter shapes per nn.Linear: weight (out, in), bias (out,).
    w1 = jax.random.normal(k_w1, (D, 2 * H), dtype=jnp.float32) * 0.05
    b1 = jax.random.normal(k_b1, (D,), dtype=jnp.float32) * 0.05
    w2 = jax.random.normal(k_w2, (V, D), dtype=jnp.float32) * 0.05
    b2 = jax.random.normal(k_b2, (V,), dtype=jnp.float32) * 0.05

    out = joint_net_forward(enc, dec, w1, b1, w2, b2)
    out = jax.block_until_ready(out)

    ref = joint_net_reference(enc, dec, w1, b1, w2, b2)
    assert out.shape == (B, T, U, V), out.shape
    # bf16 MXU operands (f32 accumulation) => loosened tolerance vs the pure
    # f32 reference.
    max_err = float(jnp.max(jnp.abs(out - ref)))
    assert jnp.allclose(out, ref, atol=2e-2, rtol=2e-2), f"max_err={max_err}"

    print("KERNEL_OK")
</pallas_src>

<mosaic_0001>
module attributes {stable_mosaic.version = 11 : i64} {
  func.func @_joint_kernel(%arg0: i32, %arg1: i32, %arg2: i32, %arg3: memref<1x8x32xbf16, #tpu.memory_space<vmem>>, %arg4: memref<1x8x32xbf16, #tpu.memory_space<vmem>>, %arg5: memref<32x64xbf16, #tpu.memory_space<vmem>>, %arg6: memref<32x64xbf16, #tpu.memory_space<vmem>>, %arg7: memref<1x64xf32, #tpu.memory_space<vmem>>, %arg8: memref<64x32xbf16, #tpu.memory_space<vmem>>, %arg9: memref<1x32xf32, #tpu.memory_space<vmem>>, %arg10: memref<1x64x32xf32, #tpu.memory_space<vmem>>, %arg11: memref<64x64xbf16, #tpu.memory_space<vmem>>) attributes {dimension_semantics = [#tpu.dimension_semantics<parallel>, #tpu.dimension_semantics<parallel>, #tpu.dimension_semantics<arbitrary>], iteration_bounds = array<i64: 2, 1, 1>, scalar_prefetch = 0 : i64, scratch_operands = 1 : i64, tpu.core_type = #tpu.core_type<tc>, window_params = [{transform_indices = @transform_0, window_bounds = array<i64: 1, 8, 32>}, {transform_indices = @transform_1, window_bounds = array<i64: 1, 8, 32>}, {pipeline_mode = #tpu.pipeline_mode<synchronous>, transform_indices = @transform_2, window_bounds = array<i64: 32, 64>}, {pipeline_mode = #tpu.pipeline_mode<synchronous>, transform_indices = @transform_3, window_bounds = array<i64: 32, 64>}, {pipeline_mode = #tpu.pipeline_mode<synchronous>, transform_indices = @transform_4, window_bounds = array<i64: 1, 64>}, {transform_indices = @transform_5, window_bounds = array<i64: 64, 32>}, {transform_indices = @transform_6, window_bounds = array<i64: 1, 32>}, {transform_indices = @transform_7, window_bounds = array<i64: 1, 64, 32>}]} {
    %c0_i32 = arith.constant 0 : i32
    %0 = arith.cmpi eq, %arg2, %c0_i32 : i32
    %1 = arith.extui %0 : i1 to i32
    %c0_i32_0 = arith.constant 0 : i32
    %2 = arith.cmpi ne, %1, %c0_i32_0 : i32
    scf.if %2 {
      %c0_9 = arith.constant 0 : index
      %c0_10 = arith.constant 0 : index
      %c0_11 = arith.constant 0 : index
      %12 = vector.load %arg3[%c0_9, %c0_10, %c0_11] : memref<1x8x32xbf16, #tpu.memory_space<vmem>>, vector<1x8x32xbf16>
      %13 = vector.shape_cast %12 : vector<1x8x32xbf16> to vector<8x32xbf16>
      %c0_12 = arith.constant 0 : index
      %c0_13 = arith.constant 0 : index
      %c0_14 = arith.constant 0 : index
      %14 = vector.load %arg4[%c0_12, %c0_13, %c0_14] : memref<1x8x32xbf16, #tpu.memory_space<vmem>>, vector<1x8x32xbf16>
      %15 = vector.shape_cast %14 : vector<1x8x32xbf16> to vector<8x32xbf16>
      %c0_15 = arith.constant 0 : index
      %c0_16 = arith.constant 0 : index
      %16 = vector.load %arg5[%c0_15, %c0_16] : memref<32x64xbf16, #tpu.memory_space<vmem>>, vector<32x64xbf16>
      %cst_17 = arith.constant dense<0.000000e+00> : vector<8x64xf32>
      %17 = tpu.matmul %13, %16, %cst_17 {dimension_numbers = #tpu.dot_dimension_numbers<[1], [0], [0], [1], [0, 0, 1, 1], [], []>} : vector<8x32xbf16>, vector<32x64xbf16>, vector<8x64xf32> -> vector<8x64xf32>
      %c0_18 = arith.constant 0 : index
      %c0_19 = arith.constant 0 : index
      %18 = vector.load %arg7[%c0_18, %c0_19] : memref<1x64xf32, #tpu.memory_space<vmem>>, vector<1x64xf32>
      %19 = vector.broadcast %18 : vector<1x64xf32> to vector<8x64xf32>
      %20 = arith.addf %17, %19 : vector<8x64xf32>
      %c0_20 = arith.constant 0 : index
      %c0_21 = arith.constant 0 : index
      %21 = vector.load %arg6[%c0_20, %c0_21] : memref<32x64xbf16, #tpu.memory_space<vmem>>, vector<32x64xbf16>
      %cst_22 = arith.constant dense<0.000000e+00> : vector<8x64xf32>
      %22 = tpu.matmul %15, %21, %cst_22 {dimension_numbers = #tpu.dot_dimension_numbers<[1], [0], [0], [1], [0, 0, 1, 1], [], []>} : vector<8x32xbf16>, vector<32x64xbf16>, vector<8x64xf32> -> vector<8x64xf32>
      %23 = vector.shape_cast %20 : vector<8x64xf32> to vector<8x1x64xf32>
      %24 = vector.shape_cast %22 : vector<8x64xf32> to vector<1x8x64xf32>
      %25 = vector.broadcast %23 : vector<8x1x64xf32> to vector<8x8x64xf32>
      %26 = vector.broadcast %24 : vector<1x8x64xf32> to vector<8x8x64xf32>
      %27 = arith.addf %25, %26 : vector<8x8x64xf32>
      %28 = math.tanh %27 : vector<8x8x64xf32>
      %29 = vector.shape_cast %28 : vector<8x8x64xf32> to vector<64x64xf32>
      %30 = arith.truncf %29 : vector<64x64xf32> to vector<64x64xbf16>
      %c0_23 = arith.constant 0 : index
      %c0_24 = arith.constant 0 : index
      %31 = vector.load %arg11[%c0_23, %c0_24] : memref<64x64xbf16, #tpu.memory_space<vmem>>, vector<64x64xbf16>
      tpu.vector_store %arg11[%c0_23, %c0_24], %30 {strides = array<i32>} : memref<64x64xbf16, #tpu.memory_space<vmem>>, vector<64x64xbf16>,
    } else {
    }
    %c0 = arith.constant 0 : index
    %c0_1 = arith.constant 0 : index
    %3 = vector.load %arg11[%c0, %c0_1] : memref<64x64xbf16, #tpu.memory_space<vmem>>, vector<64x64xbf16>
    %c0_2 = arith.constant 0 : index
    %c0_3 = arith.constant 0 : index
    %4 = vector.load %arg8[%c0_2, %c0_3] : memref<64x32xbf16, #tpu.memory_space<vmem>>, vector<64x32xbf16>
    %cst = arith.constant dense<0.000000e+00> : vector<64x32xf32>
    %5 = tpu.matmul %3, %4, %cst {dimension_numbers = #tpu.dot_dimension_numbers<[1], [0], [0], [1], [0, 0, 1, 1], [], []>} : vector<64x64xbf16>, vector<64x32xbf16>, vector<64x32xf32> -> vector<64x32xf32>
    %c0_4 = arith.constant 0 : index
    %c0_5 = arith.constant 0 : index
    %6 = vector.load %arg9[%c0_4, %c0_5] : memref<1x32xf32, #tpu.memory_space<vmem>>, vector<1x32xf32>
    %7 = vector.broadcast %6 : vector<1x32xf32> to vector<64x32xf32>
    %8 = arith.addf %5, %7 : vector<64x32xf32>
    %c0_6 = arith.constant 0 : index
    %c0_7 = arith.constant 0 : index
    %c0_8 = arith.constant 0 : index
    %9 = vector.load %arg10[%c0_6, %c0_7, %c0_8] : memref<1x64x32xf32, #tpu.memory_space<vmem>>, vector<1x64x32xf32>
    %10 = vector.shape_cast %9 : vector<1x64x32xf32> to vector<64x32xf32>
    %11 = vector.shape_cast %8 : vector<64x32xf32> to vector<1x64x32xf32>
    tpu.vector_store %arg10[%c0_6, %c0_7, %c0_8], %11 {strides = array<i32>} : memref<1x64x32xf32, #tpu.memory_space<vmem>>, vector<1x64x32xf32>,
    return
  }
  func.func @transform_0(%arg0: i32, %arg1: i32, %arg2: i32) -> (i32, i32, i32) {
    %c0_i32 = arith.constant 0 : i32
    %c0_i32_0 = arith.constant 0 : i32
    return %arg0, %arg1, %c0_i32 : i32, i32, i32
  }
  func.func @transform_1(%arg0: i32, %arg1: i32, %arg2: i32) -> (i32, i32, i32) {
    %c0_i32 = arith.constant 0 : i32
    %c0_i32_0 = arith.constant 0 : i32
    %c0_i32_1 = arith.constant 0 : i32
    return %arg0, %c0_i32, %c0_i32_0 : i32, i32, i32
  }
  func.func @transform_2(%arg0: i32, %arg1: i32, %arg2: i32) -> (i32, i32) {
    %c0_i32 = arith.constant 0 : i32
    %c0_i32_0 = arith.constant 0 : i32
    %c0_i32_1 = arith.constant 0 : i32
    return %c0_i32, %c0_i32_0 : i32, i32
  }
  func.func @transform_3(%arg0: i32, %arg1: i32, %arg2: i32) -> (i32, i32) {
    %c0_i32 = arith.constant 0 : i32
    %c0_i32_0 = arith.constant 0 : i32
    %c0_i32_1 = arith.constant 0 : i32
    return %c0_i32, %c0_i32_0 : i32, i32
  }
  func.func @transform_4(%arg0: i32, %arg1: i32, %arg2: i32) -> (i32, i32) {
    %c0_i32 = arith.constant 0 : i32
    %c0_i32_0 = arith.constant 0 : i32
    %c0_i32_1 = arith.constant 0 : i32
    return %c0_i32, %c0_i32_0 : i32, i32
  }
  func.func @transform_5(%arg0: i32, %arg1: i32, %arg2: i32) -> (i32, i32) {
    %c0_i32 = arith.constant 0 : i32
    %c0_i32_0 = arith.constant 0 : i32
    return %c0_i32, %arg2 : i32, i32
  }
  func.func @transform_6(%arg0: i32, %arg1: i32, %arg2: i32) -> (i32, i32) {
    %c0_i32 = arith.constant 0 : i32
    %c0_i32_0 = arith.constant 0 : i32
    return %c0_i32, %arg2 : i32, i32
  }
  func.func @transform_7(%arg0: i32, %arg1: i32, %arg2: i32) -> (i32, i32, i32) {
    %c0_i32 = arith.constant 0 : i32
    return %arg0, %arg1, %arg2 : i32, i32, i32
  }
}

</mosaic_0001>

<bundles_post_ra>
// kernel: tpu_custom_call.1
= control target key start
LH: loop header
LB: loop body
LE: loop exit
PB: predicated region body
PF: predicated region fallthrough
CT: control target
= control target key end

     0   :  { %s1161_s24 = smov 0   ;;  %s1163_s25 = smov 0   ;;  %s1249_s0 = inlined_call_operand.vmem [shape: bf16[2,8,32], index: 0, kind: input, shape index: {}]   ;;  %s1250_s1 = inlined_call_operand.vmem [shape: bf16[2,8,32], index: 1, kind: input, shape index: {}]   ;;  %s1251_s2 = inlined_call_operand.vmem [shape: bf16[32,64], index: 2, kind: input, shape index: {}]   ;;  %s1252_s3 = inlined_call_operand.vmem [shape: bf16[32,64], index: 3, kind: input, shape index: {}]   ;;  %s1253_s4 = inlined_call_operand.vmem [shape: f32[1,64], index: 4, kind: input, shape index: {}]   ;;  %s1254_s5 = inlined_call_operand.vmem [shape: bf16[64,32], index: 5, kind: input, shape index: {}]   ;;  %s1255_s6 = inlined_call_operand.vmem [shape: f32[1,32], index: 6, kind: input, shape index: {}]   ;;  %s1256_s7 = inlined_call_operand.vmem [shape: f32[2,64,32], index: 7, kind: output, shape index: {}]  }
   0x1   :  { %s1165_s26 = smov 0  }
   0x2 LB: > { %s36_s27 = sadd.s32 1, %s1112_s25  ;;  %p949_p0 = scmp.ge.s32.totalorder %s1116_s26, 1  ;;  %s1116_s26 = sphi %s1165_s26, %s17_s26   ;;  %s1112_s25 = sphi %s1163_s25, %s1258_s25   ;;  %s1108_s24 = sphi %s1161_s24, %s1257_s24  }
   0x3   : > { %p38_p1 = scmp.ge.s32.totalorder %s36_s27, 2  ;;  %p290_p2 = scmp.lt.s32.totalorder %s1116_s26, 3 }
   0x5   : > { %s1260_s27 = smov (%p38_p1, %s36_s27), 0  ;;  %p291_p3 = pnand %p949_p0, %p290_p2 }
   0x6   : > { %p342_p4 = scmp.lt.s32.totalorder (!%p291_p3), %s1108_s24, 1 }
   0x7   : > { %294 = sbr.rel (%p291_p3) target bundleno = 463 (0x1cf), region = 48 }
   0xc   : > { %v1066_v0 = vld [vmem:[%s1251_s2 + $0x8] sm:$0xff]   ;;  %v1118_v1 = vmov 0.0   ;;  %v1067_v2 = vld [vmem:[%s1251_s2] sm:$0xff]   ;;  %vm1119_vm0 = vmmov 0   ;;  %s1262_s24 = smov (!%p342_p4, %s1108_s24), 1  ;;  %vm403_vm1 = vcmask 261120   ;;  %v511_v13 = vlaneseq }
   0xd   : > { %1007 = vmatprep.subr.bf16.mxu1 %v1118_v1  ;;  %1011 = vmatprep.mubr.msk.bf16.mxu1 %vm1119_vm0, %v1118_v1  ;;  %s950_s9 = sshll.u32 %s1262_s24, 2  ;;  %v1068_v3 = vld [vmem:[%s1252_s3 + $0x8] sm:$0xff]   ;;  %v1069_v5 = vld [vmem:[%s1252_s3] sm:$0xff]   ;;  %v1070_v7 = vld [vmem:[%s1254_s5 + $0x18] sm:$0xff]   ;;  %v1120_v11 = vmov 1966171168  }
   0xe   : > { %1008 = vmatpush3.bf16.msra.mxu1 %v1066_v0  ;;  %s348_s14 = scalar_lea.vmem %s1249_s0, %s950_s9  ;;  %s352_s19 = scalar_lea.vmem %s1250_s1, %s950_s9  ;;  %1023 = vmatprep.subr.bf16.mxu0 %v1070_v7  ;;  %v1071_v8 = vld [vmem:[%s1254_s5 + $0x10] sm:$0xff]   ;;  %v1072_v9 = vld [vmem:[%s1254_s5 + $0x8] sm:$0xff]   ;;  %v1073_v10 = vld [vmem:[%s1254_s5] sm:$0xff]   ;;  %v509_v12 = vunpack.c.l.s4 %v1120_v11  ;;  %v512_v15 = vshrl.u32 %v511_v13, 7  ;;  %vm644_vm2 = vcmask 519168   ;;  %vm720_vm3 = vcmask 523264  }
   0xf   : > { %1009 = vmatprep.subr.bf16.mxu1 %v1118_v1  ;;  %v378_v4 = vld [vmem:[%s348_s14] sm:$0xf]  ;;  %1024 = vmatpush3.bf16.msra.mxu0 %v1070_v7  ;;  %s984_s11 = sshll.u32 %s1262_s24, 6 }
  0x10   : > { %v379_v6 = vld [vmem:[%s352_s19] sm:$0xf]  ;;  %1025 = vmatprep.subr.bf16.mxu0 %v1071_v8  ;;  %v510_v14 = vunpack.c.0.s8 %v509_v12  ;;  %v558_v23 = vsub.s32 0, %v512_v15  ;;  %s371_s16 = scalar_lea.vmem %s1256_s7, %s984_s11 }
  0x11   : > { %v954_v16 = vld [vmem:[%s1253_s4] ss:$0 sm:$0xff] }
  0x12   : > { %1010 = vmatpush3.bf16.msra.mxu1 %v1067_v2  ;;  %v513_v17 = vsub.s32 %v510_v14, %v512_v15  ;;  %v969_v13 = vld [vmem:[%s1255_s6] ss:$0 sm:$0xff] }
  0x13   : > { %1015 = vmatprep.subr.bf16.mxu1 %v1118_v1  ;;  %1026 = vmatpush3.bf16.msra.mxu0 %v1071_v8 }
  0x14   : > { %1027 = vmatprep.subr.bf16.mxu0 %v1072_v9 }
  0x15   : > { %1012 = vmatmul.mubr.msk.bf16.vlgmr.msra.gmra.mxu1 %vm403_vm1, %v378_v4 }
  0x16   : > { %1016 = vmatpush3.bf16.msra.mxu1 %v1068_v3  ;;  %1019 = vmatprep.mubr.msk.bf16.mxu1 %vm1119_vm0, %v1118_v1 }
  0x17   : > { %1017 = vmatprep.subr.bf16.mxu1 %v1118_v1  ;;  %1028 = vmatpush3.bf16.msra.mxu0 %v1072_v9 }
  0x18   : > { %1029 = vmatprep.subr.bf16.mxu0 %v1073_v10 }
  0x1a   : > { %1018 = vmatpush3.bf16.msra.mxu1 %v1069_v5 }
  0x1b   : > { %1030 = vmatpush3.bf16.msra.mxu0 %v1073_v10 }
  0x1d   : > { %1020 = vmatmul.mubr.msk.bf16.vlgmr.msra.gmra.mxu1 %vm403_vm1, %v379_v6 }
  0xd5   : > { %v441_v18 = vpop.f32.mrf.mxu1 }
  0xd6   : > { %v442_v19 = vadd.f32 %v954_v16, %v441_v18 }
  0xd7   : > { %v1013_v20 = vpop.f32.mrf.mxu1 }
  0xd8   : > { %v507_v21 = vcombine.high %v442_v19, %v442_v19  ;;  %v514_v22 = vrot.slane %v442_v19, %v513_v17 }
  0xd9   : > { %v444_v24 = vpop.f32.mrf.mxu1 }
  0xda   : > { %v521_v25 = vrot.slane %v507_v21, %v513_v17  ;;  %v522_v26 = vcombine.high %v514_v22, %v514_v22  ;;  %v530_v27 = vrot.slane %v514_v22, %v513_v17 }
  0xdb   : > { %v1014_v28 = vpop.f32.mrf.mxu1 }
  0xdc   : > { %v523_v29 = vcombine.high %v521_v25, %v521_v25  ;;  %v537_v30 = vrot.slane %v521_v25, %v513_v17  ;;  %v544_v31 = vrot.slane %v522_v26, %v513_v17  ;;  %v552_v32 = vcombine.high %v530_v27, %v530_v27 }
  0xdd   : > { %v559_v33 = vrot.slane %v530_v27, %v558_v23  ;;  %v500_v34 = vpop.f32.mrf.mxu1 }
  0xde   : > { %v551_v35 = vrot.slane %v523_v29, %v513_v17  ;;  %v553_v36 = vcombine.high %v537_v30, %v537_v30  ;;  %v554_v37 = vcombine.high %v544_v31, %v544_v31  ;;  %v563_v38 = vrot.slane %v544_v31, %v558_v23 }
  0xdf   : > { %v567_v39 = vrot.slane %v552_v32, %v558_v23  ;;  %v575_v40 = vrot.slane %v537_v30, %v558_v23  ;;  %v596_v41 = vadd.f32 %v559_v33, %v500_v34  ;;  %v1021_v42 = vpop.f32.mrf.mxu1 }
  0xe0   : > { %v555_v43 = vcombine.high %v551_v35, %v551_v35  ;;  %v571_v44 = vrot.slane %v554_v37, %v558_v23  ;;  %v579_v45 = vrot.slane %v551_v35, %v558_v23  ;;  %v583_v46 = vrot.slane %v553_v36, %v558_v23 }
  0xe1   : > { %v597_v47 = vadd.f32 %v563_v38, %v500_v34  ;;  %v598_v48 = vadd.f32 %v567_v39, %v500_v34  ;;  %1078 = vtanh.f32 %v596_v41  ;;  %v503_v49 = vpop.f32.mrf.mxu1  ;;  %v600_v52 = vadd.f32 %v575_v40, %v500_v34 }
  0xe2   : > { %v587_v50 = vrot.slane %v555_v43, %v558_v23  ;;  %v599_v51 = vadd.f32 %v571_v44, %v500_v34  ;;  %v601_v53 = vadd.f32 %v579_v45, %v500_v34  ;;  %v602_v55 = vadd.f32 %v583_v46, %v500_v34 }
  0xe3   : > { %1080 = vtanh.f32 %v597_v47  ;;  %v1022_v54 = vpop.f32.mrf.mxu1 }
  0xe4   : > { %1082 = vtanh.f32 %v598_v48  ;;  %v603_v56 = vadd.f32 %v587_v50, %v500_v34 }
  0xe5   : > { %1084 = vtanh.f32 %v599_v51 }
  0xe6   : > { %1086 = vtanh.f32 %v600_v52 }
  0xe7   : > { %1088 = vtanh.f32 %v601_v53 }
  0xe8   : > { %1090 = vtanh.f32 %v602_v55 }
  0xe9   : > { %1092 = vtanh.f32 %v603_v56 }
  0xee   : > { %v1079_v57 = vpop.eup %1078 }
  0xef   : > { %v985_v58 = vpack.c.bf16 %v1079_v57, %v1079_v57 }
  0xf0   : > { %v1081_v59 = vpop.eup %1080 }
  0xf1   : > { %v1083_v60 = vpop.eup %1082  ;;  %v986_v61 = vpack.c.bf16 %v1081_v59, %v1081_v59  ;;  %645 = vst.msk [vmem:[#allocation2] sm:$0xf] %vm644_vm2, %v985_v58 }
  0xf2   : > { %v1085_v62 = vpop.eup %1084  ;;  %v987_v63 = vpack.c.bf16 %v1083_v60, %v1083_v60 }
  0xf3   : > { %v1087_v0 = vpop.eup %1086  ;;  %v988_v1 = vpack.c.bf16 %v1085_v62, %v1085_v62  ;;  %646 = vst.msk [vmem:[#allocation2 + $0x4] sm:$0xf] %vm644_vm2, %v986_v61 }
  0xf4   : > { %v1089_v2 = vpop.eup %1088  ;;  %v989_v3 = vpack.c.bf16 %v1087_v0, %v1087_v0  ;;  %647 = vst.msk [vmem:[#allocation2 + $0x8] sm:$0xf] %vm644_vm2, %v987_v63 }
  0xf5   : > { %v1091_v4 = vpop.eup %1090  ;;  %v990_v5 = vpack.c.bf16 %v1089_v2, %v1089_v2  ;;  %648 = vst.msk [vmem:[#allocation2 + $0xc] sm:$0xf] %vm644_vm2, %v988_v1 }
  0xf6   : > { %v1093_v6 = vpop.eup %1092  ;;  %v991_v7 = vpack.c.bf16 %v1091_v4, %v1091_v4  ;;  %649 = vst.msk [vmem:[#allocation2 + $0x10] sm:$0xf] %vm644_vm2, %v989_v3 }
  0xf7   : > { %v992_v8 = vpack.c.bf16 %v1093_v6, %v1093_v6  ;;  %650 = vst.msk [vmem:[#allocation2 + $0x14] sm:$0xf] %vm644_vm2, %v990_v5 }
  0xf8   : > { %651 = vst.msk [vmem:[#allocation2 + $0x18] sm:$0xf] %vm644_vm2, %v991_v7 }
  0xf9   : > { %652 = vst.msk [vmem:[#allocation2 + $0x1c] sm:$0xf] %vm644_vm2, %v992_v8 }
  0xfa   : > { %v1074_v9 = vld [vmem:[#allocation2] sm:$0xff]  }
  0xfb   : > { %1031 = vmatprep.mubr.msk.bf16.mxu0 %vm720_vm3, %v1074_v9 }
  0xfc   : > { %v1075_v10 = vld [vmem:[#allocation2 + $0x8] sm:$0xff]  }
  0xfd   : > { %1032 = vmatmul.mubr.msk.bf16.vlgmr.msra.gmra.mxu0 %vm720_vm3, %v1075_v10 }
  0xfe   : > { %v1076_v11 = vld [vmem:[#allocation2 + $0x10] sm:$0xff]  }
  0xff   : > { %1035 = vmatprep.mubr.msk.bf16.mxu0 %vm720_vm3, %v1076_v11 }
 0x100   : > { %v1077_v12 = vld [vmem:[#allocation2 + $0x18] sm:$0xff]  }
 0x105   : > { %1036 = vmatmul.mubr.msk.bf16.gmra.mxu0 %vm720_vm3, %v1077_v12 }
 0x1bd   : > { %v1033_v14 = vpop.f32.mrf.mxu0 }
 0x1be   : > { %v776_v15 = vadd.f32 %v1033_v14, %v969_v13 }
 0x1bf   : > { %v767_v16 = vpop.f32.mrf.mxu0 }
 0x1c0   : > { %801 = vst.msk [vmem:[%s371_s16 + $0x10] sm:$0xff] %vm403_vm1, %v776_v15  ;;  %v768_v17 = vadd.f32 %v969_v13, %v767_v16 }
 0x1c1   : > { %v1034_v18 = vpop.f32.mrf.mxu0 }
 0x1c2   : > { %799 = vst.msk [vmem:[%s371_s16] sm:$0xff] %vm403_vm1, %v768_v17  ;;  %v779_v19 = vadd.f32 %v1034_v18, %v969_v13 }
 0x1c3   : > { %v770_v20 = vpop.f32.mrf.mxu0 }
 0x1c4   : > { %802 = vst.msk [vmem:[%s371_s16 + $0x18] sm:$0xff] %vm403_vm1, %v779_v19  ;;  %v771_v21 = vadd.f32 %v969_v13, %v770_v20 }
 0x1c5   : > { %v1037_v22 = vpop.f32.mrf.mxu0 }
 0x1c6   : > { %800 = vst.msk [vmem:[%s371_s16 + $0x8] sm:$0xff] %vm403_vm1, %v771_v21  ;;  %v792_v23 = vadd.f32 %v1037_v22, %v969_v13 }
 0x1c7   : > { %v783_v24 = vpop.f32.mrf.mxu0 }
 0x1c8   : > { %805 = vst.msk [vmem:[%s371_s16 + $0x30] sm:$0xff] %vm403_vm1, %v792_v23  ;;  %v784_v25 = vadd.f32 %v969_v13, %v783_v24 }
 0x1c9   : > { %v1038_v26 = vpop.f32.mrf.mxu0 }
 0x1ca   : > { %803 = vst.msk [vmem:[%s371_s16 + $0x20] sm:$0xff] %vm403_vm1, %v784_v25  ;;  %v795_v27 = vadd.f32 %v1038_v26, %v969_v13 }
 0x1cb   : > { %v786_v28 = vpop.f32.mrf.mxu0 }
 0x1cc   : > { %806 = vst.msk [vmem:[%s371_s16 + $0x38] sm:$0xff] %vm403_vm1, %v795_v27  ;;  %v787_v29 = vadd.f32 %v969_v13, %v786_v28 }
 0x1ce   : > { %804 = vst.msk [vmem:[%s371_s16 + $0x28] sm:$0xff] %vm403_vm1, %v787_v29 }
 0x1cf PF: > { %s17_s26 = sadd.s32 1, %s1116_s26   ;;  %s1257_s24 = smov %s1112_s25 }
 0x1d0   : > { %p14_p5 = scmp.ge.s32.totalorder %s17_s26, 4   ;;  %s1258_s25 = smov %s1260_s27 }
 0x1d2   :  { %16 = sbr.rel (!%p14_p5) target bundleno = 2 (0x2), region = 91 }

</bundles_post_ra>
